<compile_context>
chip_gen: v7x
topology: tpu7x:2x2x1
jax: 0.10.0
libtpu: 0.0.40
codegen_flags: <defaults>
</compile_context>

<pallas_src>
import functools

import jax
import jax.numpy as jnp
from jax import lax
from jax.experimental import pallas as pl
from jax.experimental.pallas import tpu as pltpu

VOCAB = 10
VOCAB_PAD = 16  # sublane-aligned (f32 needs multiples of 8 on the 2nd-minor dim)


def text_encoder_kernel(x_ref, emb_ref, w2_ref, b2_ref, w3_ref, b3_ref,
                        out_ref):
    """One batch tile of the table-folded TextEncoder forward.

    x_ref   : (tb, 1)            int32 labels in [0, VOCAB)
    emb_ref : (VOCAB_PAD, H)     f32, swish already folded in: swish(emb) (pad rows = 0)
    w2_ref  : (H, H)             f32
    b2_ref  : (1, H)             f32
    w3_ref  : (H, out_pad)       f32, [w31 | w32 | zero pad]
    b3_ref  : (1, out_pad)       f32
    out_ref : (tb, out_pad)      f32, [mu | logvar | pad]
    """
    # --- fold the whole network into a VOCAB_PAD-row output table -----------
    # 16-row forward instead of a B-row forward: ~8 MFLOP, negligible, and the
    # per-example work below only touches a ~5 KiB table.
    h = emb_ref[...]                                              # swish(fc1) rows
    h2 = jnp.dot(h, w2_ref[...],
                 preferred_element_type=jnp.float32) + b2_ref[...]
    h2 = h2 * jax.nn.sigmoid(h2)                                  # swish(fc2)
    table = jnp.dot(h2, w3_ref[...],
                    preferred_element_type=jnp.float32) + b3_ref[...]  # (16, out_pad)

    # --- per-example lookup via exact 0/1 one-hot --------------------------
    # TODO(synk): with x prefetched to SMEM the rows could be gathered directly
    # and this tiny K=16 MXU push skipped; negligible below tile_b ~ 512.
    x = x_ref[...]                                                # (tb, 1) int32
    tb = x.shape[0]
    iota = lax.broadcasted_iota(jnp.int32, (tb, VOCAB_PAD), 1)
    onehot = (iota == x).astype(jnp.float32)                      # exact 0/1
    out_ref[...] = jnp.dot(onehot, table,
                           preferred_element_type=jnp.float32)


def _round_up(n, m):
    return ((n + m - 1) // m) * m


@functools.partial(jax.jit, static_argnames=("tile_b_cap",))
def text_encoder(x, params, *, tile_b_cap=1024):
    """x: (B, 1) integer labels; params: f32 weights in (in, out) layout,
    biases (1, out), embedding (vocab, hidden). Returns (mu, logvar)."""
    B = x.shape[0]
    vocab, hidden = params["emb"].shape
    assert vocab <= VOCAB_PAD
    n_latents = params["w31"].shape[1]
    x = x.astype(jnp.int32)                     # mirrors x.to(torch.int64)

    # --- wrapper-side preprocessing (plain JAX, differentiable) -------------
    # Fold swish into the embedding table, fuse the two heads, pad the fused
    # head to a multiple of 128 lanes and the vocab to a multiple of 8 rows.
    emb_sw = params["emb"] * jax.nn.sigmoid(params["emb"])
    emb_sw = jnp.pad(emb_sw, ((0, VOCAB_PAD - vocab), (0, 0)))    # (16, H)

    out_dim = 2 * n_latents
    out_pad = _round_up(out_dim, 128)
    w3 = jnp.concatenate([params["w31"], params["w32"]], axis=1)
    b3 = jnp.concatenate([params["b31"], params["b32"]], axis=1)
    if out_pad != out_dim:
        w3 = jnp.pad(w3, ((0, 0), (0, out_pad - out_dim)))
        b3 = jnp.pad(b3, ((0, 0), (0, out_pad - out_dim)))
    w2 = params["w2"]
    b2 = params["b2"]

    # --- batch tiling --------------------------------------------------------
    # B < 16  : grid=(1,), tb = round_up(B, 8)   (no wasted grid steps, no
    #           full-128 pad tile on v5e/v6e single-core parts)
    # B >= 16 : two tiles so v7x's two TensorCores both run the parallel axis;
    #           capped at tile_b_cap rows to stay far under v7x's 64 MiB VMEM.
    if B >= 16:
        tb = min(tile_b_cap, _round_up(-(-B // 2), 8))
    else:
        tb = _round_up(B, 8)
    n_tiles = pl.cdiv(B, tb)
    Bp = n_tiles * tb
    xp = x if Bp == B else jnp.pad(x, ((0, Bp - B), (0, 0)))      # pad label 0

    flops = (n_tiles * 2 * VOCAB_PAD * (hidden * hidden + hidden * out_pad)
             + 2 * Bp * VOCAB_PAD * out_pad
             + 4 * n_tiles * VOCAB_PAD * hidden)
    bytes_accessed = (xp.size * 4
                      + (emb_sw.size + w2.size + b2.size + w3.size + b3.size) * 4
                      + Bp * out_pad * 4)
    cost = pl.CostEstimate(flops=flops,
                           transcendentals=n_tiles * VOCAB_PAD * hidden,
                           bytes_accessed=bytes_accessed)

    # NOTE: the five weight/bias inputs have constant index_maps, so they are
    # DMA'd once and stay resident across grid steps (no re-fetch per tile).
    out = pl.pallas_call(
        text_encoder_kernel,
        out_shape=jax.ShapeDtypeStruct((Bp, out_pad), jnp.float32),
        grid=(n_tiles,),
        in_specs=[
            pl.BlockSpec((tb, 1), lambda i: (i, 0)),              # x: tiled over B
            pl.BlockSpec((VOCAB_PAD, hidden), lambda i: (0, 0)),  # weights pinned
            pl.BlockSpec((hidden, hidden), lambda i: (0, 0)),
            pl.BlockSpec((1, hidden), lambda i: (0, 0)),
            pl.BlockSpec((hidden, out_pad), lambda i: (0, 0)),
            pl.BlockSpec((1, out_pad), lambda i: (0, 0)),
        ],
        out_specs=pl.BlockSpec((tb, out_pad), lambda i: (i, 0)),
        compiler_params=pltpu.CompilerParams(
            dimension_semantics=("parallel",)),
        cost_estimate=cost,
    )(xp, emb_sw, w2, b2, w3, b3)

    out = out[:B, :out_dim]
    mu = out[:, :n_latents]
    logvar = out[:, n_latents:]
    return mu, logvar


def init_params(key, n_latents, hidden=512, vocab=VOCAB):
    ks = jax.random.split(key, 7)
    scale = 0.05
    return {
        "emb": scale * jax.random.normal(ks[0], (vocab, hidden), jnp.float32),
        "w2":  scale * jax.random.normal(ks[1], (hidden, hidden), jnp.float32),
        "b2":  scale * jax.random.normal(ks[2], (1, hidden), jnp.float32),
        "w31": scale * jax.random.normal(ks[3], (hidden, n_latents), jnp.float32),
        "b31": scale * jax.random.normal(ks[4], (1, n_latents), jnp.float32),
        "w32": scale * jax.random.normal(ks[5], (hidden, n_latents), jnp.float32),
        "b32": scale * jax.random.normal(ks[6], (1, n_latents), jnp.float32),
    }


def reference(x, params):
    # Pure-JAX f32 reference mirroring the PyTorch forward exactly.
    h = params["emb"][x[:, 0]]                                   # fc1 (embedding)
    h = h * jax.nn.sigmoid(h)                                    # swish
    h2 = jnp.dot(h, params["w2"]) + params["b2"]                 # fc2
    h2 = h2 * jax.nn.sigmoid(h2)                                 # swish
    mu = jnp.dot(h2, params["w31"]) + params["b31"]              # fc31
    logvar = jnp.dot(h2, params["w32"]) + params["b32"]          # fc32
    return mu, logvar


if __name__ == "__main__":
    B = 8
    n_latents = 32

    key = jax.random.PRNGKey(0)
    k_x, k_p = jax.random.split(key)
    x = jax.random.randint(k_x, (B, 1), 0, VOCAB, dtype=jnp.int32)
    params = init_params(k_p, n_latents)

    mu, logvar = text_encoder(x, params)
    jax.block_until_ready((mu, logvar))

    mu_ref, logvar_ref = reference(x, params)
    assert mu.shape == (B, n_latents) and logvar.shape == (B, n_latents)
    err_mu = float(jnp.max(jnp.abs(mu - mu_ref)))
    err_lv = float(jnp.max(jnp.abs(logvar - logvar_ref)))
    assert err_mu < 2e-3, err_mu
    assert err_lv < 2e-3, err_lv

    print("KERNEL_OK")
</pallas_src>

<mosaic_0001>
module attributes {stable_mosaic.version = 11 : i64} {
  func.func @text_encoder_kernel(%arg0: i32, %arg1: memref<8x1xi32, #tpu.memory_space<vmem>>, %arg2: memref<16x512xf32, #tpu.memory_space<vmem>>, %arg3: memref<512x512xf32, #tpu.memory_space<vmem>>, %arg4: memref<1x512xf32, #tpu.memory_space<vmem>>, %arg5: memref<512x128xf32, #tpu.memory_space<vmem>>, %arg6: memref<1x128xf32, #tpu.memory_space<vmem>>, %arg7: memref<8x128xf32, #tpu.memory_space<vmem>>) attributes {dimension_semantics = [#tpu.dimension_semantics<parallel>], iteration_bounds = array<i64: 1>, scalar_prefetch = 0 : i64, scratch_operands = 0 : i64, tpu.core_type = #tpu.core_type<tc>, window_params = [{transform_indices = @transform_0, window_bounds = array<i64: 8, 1>}, {pipeline_mode = #tpu.pipeline_mode<synchronous>, transform_indices = @transform_1, window_bounds = array<i64: 16, 512>}, {pipeline_mode = #tpu.pipeline_mode<synchronous>, transform_indices = @transform_2, window_bounds = array<i64: 512, 512>}, {pipeline_mode = #tpu.pipeline_mode<synchronous>, transform_indices = @transform_3, window_bounds = array<i64: 1, 512>}, {pipeline_mode = #tpu.pipeline_mode<synchronous>, transform_indices = @transform_4, window_bounds = array<i64: 512, 128>}, {pipeline_mode = #tpu.pipeline_mode<synchronous>, transform_indices = @transform_5, window_bounds = array<i64: 1, 128>}, {transform_indices = @transform_6, window_bounds = array<i64: 8, 128>}]} {
    %c0 = arith.constant 0 : index
    %c0_0 = arith.constant 0 : index
    %0 = vector.load %arg2[%c0, %c0_0] : memref<16x512xf32, #tpu.memory_space<vmem>>, vector<16x512xf32>
    %c0_1 = arith.constant 0 : index
    %c0_2 = arith.constant 0 : index
    %1 = vector.load %arg3[%c0_1, %c0_2] : memref<512x512xf32, #tpu.memory_space<vmem>>, vector<512x512xf32>
    %cst = arith.constant dense<0.000000e+00> : vector<16x512xf32>
    %2 = tpu.matmul %0, %1, %cst {dimension_numbers = #tpu.dot_dimension_numbers<[1], [0], [0], [1], [0, 0, 1, 1], [], []>} : vector<16x512xf32>, vector<512x512xf32>, vector<16x512xf32> -> vector<16x512xf32>
    %c0_3 = arith.constant 0 : index
    %c0_4 = arith.constant 0 : index
    %3 = vector.load %arg4[%c0_3, %c0_4] : memref<1x512xf32, #tpu.memory_space<vmem>>, vector<1x512xf32>
    %4 = vector.broadcast %3 : vector<1x512xf32> to vector<16x512xf32>
    %5 = arith.addf %2, %4 : vector<16x512xf32>
    %6 = arith.negf %5 : vector<16x512xf32>
    %7 = math.exp %6 : vector<16x512xf32>
    %cst_5 = arith.constant 1.000000e+00 : f32
    %8 = vector.broadcast %cst_5 : f32 to vector<16x512xf32>
    %9 = arith.addf %8, %7 : vector<16x512xf32>
    %10 = arith.divf %8, %9 : vector<16x512xf32>
    %11 = arith.mulf %5, %10 : vector<16x512xf32>
    %c0_6 = arith.constant 0 : index
    %c0_7 = arith.constant 0 : index
    %12 = vector.load %arg5[%c0_6, %c0_7] : memref<512x128xf32, #tpu.memory_space<vmem>>, vector<512x128xf32>
    %cst_8 = arith.constant dense<0.000000e+00> : vector<16x128xf32>
    %13 = tpu.matmul %11, %12, %cst_8 {dimension_numbers = #tpu.dot_dimension_numbers<[1], [0], [0], [1], [0, 0, 1, 1], [], []>} : vector<16x512xf32>, vector<512x128xf32>, vector<16x128xf32> -> vector<16x128xf32>
    %c0_9 = arith.constant 0 : index
    %c0_10 = arith.constant 0 : index
    %14 = vector.load %arg6[%c0_9, %c0_10] : memref<1x128xf32, #tpu.memory_space<vmem>>, vector<1x128xf32>
    %15 = vector.broadcast %14 : vector<1x128xf32> to vector<16x128xf32>
    %16 = arith.addf %13, %15 : vector<16x128xf32>
    %c0_11 = arith.constant 0 : index
    %c0_12 = arith.constant 0 : index
    %17 = vector.load %arg1[%c0_11, %c0_12] : memref<8x1xi32, #tpu.memory_space<vmem>>, vector<8x1xi32>
    %18 = tpu.iota {dimensions = array<i32: 1>} : vector<8x16xi32>
    %19 = vector.broadcast %17 : vector<8x1xi32> to vector<8x16xi32>
    %20 = arith.cmpi eq, %18, %19 : vector<8x16xi32>
    %21 = arith.extui %20 : vector<8x16xi1> to vector<8x16xi32>
    %22 = arith.sitofp %21 : vector<8x16xi32> to vector<8x16xf32>
    %cst_13 = arith.constant dense<0.000000e+00> : vector<8x128xf32>
    %23 = tpu.matmul %22, %16, %cst_13 {dimension_numbers = #tpu.dot_dimension_numbers<[1], [0], [0], [1], [0, 0, 1, 1], [], []>} : vector<8x16xf32>, vector<16x128xf32>, vector<8x128xf32> -> vector<8x128xf32>
    %c0_14 = arith.constant 0 : index
    %c0_15 = arith.constant 0 : index
    %24 = vector.load %arg7[%c0_14, %c0_15] : memref<8x128xf32, #tpu.memory_space<vmem>>, vector<8x128xf32>
    tpu.vector_store %arg7[%c0_14, %c0_15], %23 {strides = array<i32>} : memref<8x128xf32, #tpu.memory_space<vmem>>, vector<8x128xf32>,
    return
  }
  func.func @transform_0(%arg0: i32) -> (i32, i32) {
    %c0_i32 = arith.constant 0 : i32
    %c0_i32_0 = arith.constant 0 : i32
    return %arg0, %c0_i32 : i32, i32
  }
  func.func @transform_1(%arg0: i32) -> (i32, i32) {
    %c0_i32 = arith.constant 0 : i32
    %c0_i32_0 = arith.constant 0 : i32
    %c0_i32_1 = arith.constant 0 : i32
    return %c0_i32, %c0_i32_0 : i32, i32
  }
  func.func @transform_2(%arg0: i32) -> (i32, i32) {
    %c0_i32 = arith.constant 0 : i32
    %c0_i32_0 = arith.constant 0 : i32
    %c0_i32_1 = arith.constant 0 : i32
    return %c0_i32, %c0_i32_0 : i32, i32
  }
  func.func @transform_3(%arg0: i32) -> (i32, i32) {
    %c0_i32 = arith.constant 0 : i32
    %c0_i32_0 = arith.constant 0 : i32
    %c0_i32_1 = arith.constant 0 : i32
    return %c0_i32, %c0_i32_0 : i32, i32
  }
  func.func @transform_4(%arg0: i32) -> (i32, i32) {
    %c0_i32 = arith.constant 0 : i32
    %c0_i32_0 = arith.constant 0 : i32
    %c0_i32_1 = arith.constant 0 : i32
    return %c0_i32, %c0_i32_0 : i32, i32
  }
  func.func @transform_5(%arg0: i32) -> (i32, i32) {
    %c0_i32 = arith.constant 0 : i32
    %c0_i32_0 = arith.constant 0 : i32
    %c0_i32_1 = arith.constant 0 : i32
    return %c0_i32, %c0_i32_0 : i32, i32
  }
  func.func @transform_6(%arg0: i32) -> (i32, i32) {
    %c0_i32 = arith.constant 0 : i32
    %c0_i32_0 = arith.constant 0 : i32
    return %arg0, %c0_i32 : i32, i32
  }
}

</mosaic_0001>

<bundles_post_ra>
// kernel: text_encoder.1
= control target key start
LH: loop header
LB: loop body
LE: loop exit
PB: predicated region body
PF: predicated region fallthrough
CT: control target
= control target key end

     0   :  { %vm1457_vm0 = vmmov 0   ;;  %vm903_vm2 = vcmask 130048   ;;  %s2492_s2 = inlined_call_operand.vmem [shape: f32[512,512], index: 2, kind: input, shape index: {}]   ;;  %s2493_s1 = inlined_call_operand.vmem [shape: f32[16,512], index: 1, kind: input, shape index: {}]   ;;  %s2494_s4 = inlined_call_operand.vmem [shape: f32[512,128], index: 4, kind: input, shape index: {}]   ;;  %s2495_s0 = inlined_call_operand.vmem [shape: s32[8,1], index: 0, kind: input, shape index: {}]   ;;  %s2496_s3 = inlined_call_operand.vmem [shape: f32[1,512], index: 3, kind: input, shape index: {}]   ;;  %s2497_s5 = inlined_call_operand.vmem [shape: f32[1,128], index: 5, kind: input, shape index: {}]   ;;  %s2498_s6 = inlined_call_operand.vmem [shape: f32[8,128], index: 6, kind: output, shape index: {}]  }
   0x1   :  { %v32_v0 = vld [vmem:[%s2492_s2 + $0x8] sm:$0xff]  ;;  %v34_v2 = vld [vmem:[%s2492_s2 + $0x18] sm:$0xff]  ;;  %v31_v5 = vld [vmem:[%s2492_s2] sm:$0xff] }
   0x2   :  { %v36_v1 = vld [vmem:[%s2492_s2 + $0x28] sm:$0xff]  ;;  %v38_v4 = vld [vmem:[%s2492_s2 + $0x38] sm:$0xff]  ;;  %v35_v6 = vld [vmem:[%s2492_s2 + $0x20] sm:$0xff] }
   0x3   :  { %v1079_v3 = vpack.c.bf16 %v36_v1, %v32_v0  ;;  %v1207_v7 = vpack.c.bf16 %v38_v4, %v34_v2  ;;  %v1081_v8 = vpack.c.bf16 %v35_v6, %v31_v5  ;;  %v33_v9 = vld [vmem:[%s2492_s2 + $0x10] sm:$0xff]  ;;  %v40_v11 = vld [vmem:[%s2492_s2 + $0x48] sm:$0xff]  ;;  %v42_v14 = vld [vmem:[%s2492_s2 + $0x58] sm:$0xff] }
   0x4   :  { %v37_v10 = vld [vmem:[%s2492_s2 + $0x30] sm:$0xff]  ;;  %v44_v13 = vld [vmem:[%s2492_s2 + $0x68] sm:$0xff]  ;;  %v46_v15 = vld [vmem:[%s2492_s2 + $0x78] sm:$0xff] }
   0x5   :  { %1080 = vmatprep.subr.bf16.mxu0 %v1079_v3  ;;  %v1209_v12 = vpack.c.bf16 %v37_v10, %v33_v9  ;;  %1208 = vmatprep.subr.bf16.mxu1 %v1207_v7  ;;  %v1083_v16 = vpack.c.bf16 %v44_v13, %v40_v11  ;;  %v1211_v17 = vpack.c.bf16 %v46_v15, %v42_v14  ;;  %v39_v18 = vld [vmem:[%s2492_s2 + $0x40] sm:$0xff]  ;;  %v41_v20 = vld [vmem:[%s2492_s2 + $0x50] sm:$0xff]  ;;  %v48_v23 = vld [vmem:[%s2492_s2 + $0x88] sm:$0xff] }
   0x6   :  { %1082 = vmatpush1.bf16.msra.mxu0 %v1081_v8  ;;  %v43_v19 = vld [vmem:[%s2492_s2 + $0x60] sm:$0xff]  ;;  %v45_v22 = vld [vmem:[%s2492_s2 + $0x70] sm:$0xff]  ;;  %v52_v24 = vld [vmem:[%s2492_s2 + $0xa8] sm:$0xff] }
   0x7   :  { %1210 = vmatpush1.bf16.msra.mxu1 %v1209_v12  ;;  %v1085_v21 = vpack.c.bf16 %v43_v19, %v39_v18  ;;  %1084 = vmatprep.subr.bf16.mxu0 %v1083_v16  ;;  %v1213_v25 = vpack.c.bf16 %v45_v22, %v41_v20  ;;  %v1087_v26 = vpack.c.bf16 %v52_v24, %v48_v23  ;;  %v50_v27 = vld [vmem:[%s2492_s2 + $0x98] sm:$0xff]  ;;  %v47_v29 = vld [vmem:[%s2492_s2 + $0x80] sm:$0xff]  ;;  %v49_v32 = vld [vmem:[%s2492_s2 + $0x90] sm:$0xff] }
   0x8   :  { %1212 = vmatprep.subr.bf16.mxu1 %v1211_v17  ;;  %v54_v28 = vld [vmem:[%s2492_s2 + $0xb8] sm:$0xff]  ;;  %v51_v31 = vld [vmem:[%s2492_s2 + $0xa0] sm:$0xff]  ;;  %v53_v33 = vld [vmem:[%s2492_s2 + $0xb0] sm:$0xff] }
   0x9   :  { %v1215_v30 = vpack.c.bf16 %v54_v28, %v50_v27  ;;  %v1089_v34 = vpack.c.bf16 %v51_v31, %v47_v29  ;;  %v56_v35 = vld [vmem:[%s2492_s2 + $0xc8] sm:$0xff]  ;;  %v58_v37 = vld [vmem:[%s2492_s2 + $0xd8] sm:$0xff]  ;;  %v1217_v38 = vpack.c.bf16 %v53_v33, %v49_v32  ;;  %v55_v41 = vld [vmem:[%s2492_s2 + $0xc0] sm:$0xff] }
   0xa   :  { %1086 = vmatpush1.bf16.msra.mxu0 %v1085_v21  ;;  %v60_v36 = vld [vmem:[%s2492_s2 + $0xe8] sm:$0xff]  ;;  %v62_v40 = vld [vmem:[%s2492_s2 + $0xf8] sm:$0xff]  ;;  %v59_v42 = vld [vmem:[%s2492_s2 + $0xe0] sm:$0xff] }
   0xb   :  { %1214 = vmatpush1.bf16.msra.mxu1 %v1213_v25  ;;  %1088 = vmatprep.subr.bf16.mxu0 %v1087_v26  ;;  %v1091_v39 = vpack.c.bf16 %v60_v36, %v56_v35  ;;  %v1219_v43 = vpack.c.bf16 %v62_v40, %v58_v37  ;;  %v57_v44 = vld [vmem:[%s2492_s2 + $0xd0] sm:$0xff]  ;;  %v64_v46 = vld [vmem:[%s2492_s2 + $0x108] sm:$0xff]  ;;  %v66_v48 = vld [vmem:[%s2492_s2 + $0x118] sm:$0xff]  ;;  %v1093_v50 = vpack.c.bf16 %v59_v42, %v55_v41 }
   0xc   :  { %1216 = vmatprep.subr.bf16.mxu1 %v1215_v30  ;;  %v61_v45 = vld [vmem:[%s2492_s2 + $0xf0] sm:$0xff]  ;;  %v68_v47 = vld [vmem:[%s2492_s2 + $0x128] sm:$0xff]  ;;  %v70_v49 = vld [vmem:[%s2492_s2 + $0x138] sm:$0xff] }
   0xd   :  { %v1221_v51 = vpack.c.bf16 %v61_v45, %v57_v44  ;;  %v1095_v52 = vpack.c.bf16 %v68_v47, %v64_v46  ;;  %v63_v53 = vld [vmem:[%s2492_s2 + $0x100] sm:$0xff]  ;;  %v65_v55 = vld [vmem:[%s2492_s2 + $0x110] sm:$0xff]  ;;  %v1223_v56 = vpack.c.bf16 %v70_v49, %v66_v48  ;;  %v72_v58 = vld [vmem:[%s2492_s2 + $0x148] sm:$0xff] }
   0xe   :  { %1090 = vmatpush1.bf16.msra.mxu0 %v1089_v34  ;;  %v67_v54 = vld [vmem:[%s2492_s2 + $0x120] sm:$0xff]  ;;  %v69_v57 = vld [vmem:[%s2492_s2 + $0x130] sm:$0xff]  ;;  %v76_v59 = vld [vmem:[%s2492_s2 + $0x168] sm:$0xff] }
   0xf   :  { %1218 = vmatpush1.bf16.msra.mxu1 %v1217_v38  ;;  %1092 = vmatprep.subr.bf16.mxu0 %v1091_v39  ;;  %v74_v60 = vld [vmem:[%s2492_s2 + $0x158] sm:$0xff]  ;;  %v1097_v62 = vpack.c.bf16 %v67_v54, %v63_v53  ;;  %v1225_v63 = vpack.c.bf16 %v69_v57, %v65_v55  ;;  %v1099_v0 = vpack.c.bf16 %v76_v59, %v72_v58  ;;  %v71_v1 = vld [vmem:[%s2492_s2 + $0x140] sm:$0xff]  ;;  %v73_v3 = vld [vmem:[%s2492_s2 + $0x150] sm:$0xff] }
  0x10   :  { %1220 = vmatprep.subr.bf16.mxu1 %v1219_v43  ;;  %v78_v61 = vld [vmem:[%s2492_s2 + $0x178] sm:$0xff]  ;;  %v75_v2 = vld [vmem:[%s2492_s2 + $0x160] sm:$0xff]  ;;  %v77_v5 = vld [vmem:[%s2492_s2 + $0x170] sm:$0xff] }
  0x11   :  { %v1227_v4 = vpack.c.bf16 %v78_v61, %v74_v60  ;;  %v80_v6 = vld [vmem:[%s2492_s2 + $0x188] sm:$0xff]  ;;  %v82_v8 = vld [vmem:[%s2492_s2 + $0x198] sm:$0xff]  ;;  %v1101_v10 = vpack.c.bf16 %v75_v2, %v71_v1  ;;  %v1229_v11 = vpack.c.bf16 %v77_v5, %v73_v3  ;;  %v79_v13 = vld [vmem:[%s2492_s2 + $0x180] sm:$0xff] }
  0x12   :  { %1094 = vmatpush1.bf16.msra.mxu0 %v1093_v50  ;;  %v84_v7 = vld [vmem:[%s2492_s2 + $0x1a8] sm:$0xff]  ;;  %v86_v9 = vld [vmem:[%s2492_s2 + $0x1b8] sm:$0xff]  ;;  %v83_v14 = vld [vmem:[%s2492_s2 + $0x1a0] sm:$0xff] }
  0x13   :  { %1222 = vmatpush1.bf16.msra.mxu1 %v1221_v51  ;;  %1096 = vmatprep.subr.bf16.mxu0 %v1095_v52  ;;  %v1103_v12 = vpack.c.bf16 %v84_v7, %v80_v6  ;;  %v81_v15 = vld [vmem:[%s2492_s2 + $0x190] sm:$0xff]  ;;  %v1231_v16 = vpack.c.bf16 %v86_v9, %v82_v8  ;;  %v88_v18 = vld [vmem:[%s2492_s2 + $0x1c8] sm:$0xff]  ;;  %v90_v20 = vld [vmem:[%s2492_s2 + $0x1d8] sm:$0xff]  ;;  %v1105_v22 = vpack.c.bf16 %v83_v14, %v79_v13 }
  0x14   :  { %1224 = vmatprep.subr.bf16.mxu1 %v1223_v56  ;;  %v85_v17 = vld [vmem:[%s2492_s2 + $0x1b0] sm:$0xff]  ;;  %v92_v19 = vld [vmem:[%s2492_s2 + $0x1e8] sm:$0xff]  ;;  %v94_v21 = vld [vmem:[%s2492_s2 + $0x1f8] sm:$0xff] }
  0x15   :  { %v1233_v23 = vpack.c.bf16 %v85_v17, %v81_v15  ;;  %v1107_v24 = vpack.c.bf16 %v92_v19, %v88_v18  ;;  %v87_v25 = vld [vmem:[%s2492_s2 + $0x1c0] sm:$0xff]  ;;  %v89_v27 = vld [vmem:[%s2492_s2 + $0x1d0] sm:$0xff]  ;;  %v1235_v28 = vpack.c.bf16 %v94_v21, %v90_v20  ;;  %v96_v30 = vld [vmem:[%s2492_s2 + $0x208] sm:$0xff] }
  0x16   :  { %1098 = vmatpush1.bf16.msra.mxu0 %v1097_v62  ;;  %v91_v26 = vld [vmem:[%s2492_s2 + $0x1e0] sm:$0xff]  ;;  %v93_v29 = vld [vmem:[%s2492_s2 + $0x1f0] sm:$0xff]  ;;  %v100_v31 = vld [vmem:[%s2492_s2 + $0x228] sm:$0xff] }
  0x17   :  { %1226 = vmatpush1.bf16.msra.mxu1 %v1225_v63  ;;  %1100 = vmatprep.subr.bf16.mxu0 %v1099_v0  ;;  %v98_v32 = vld [vmem:[%s2492_s2 + $0x218] sm:$0xff]  ;;  %v1109_v34 = vpack.c.bf16 %v91_v26, %v87_v25  ;;  %v1237_v35 = vpack.c.bf16 %v93_v29, %v89_v27  ;;  %v1111_v36 = vpack.c.bf16 %v100_v31, %v96_v30  ;;  %v95_v37 = vld [vmem:[%s2492_s2 + $0x200] sm:$0xff]  ;;  %v97_v39 = vld [vmem:[%s2492_s2 + $0x210] sm:$0xff] }
  0x18   :  { %1228 = vmatprep.subr.bf16.mxu1 %v1227_v4  ;;  %v102_v33 = vld [vmem:[%s2492_s2 + $0x238] sm:$0xff]  ;;  %v99_v38 = vld [vmem:[%s2492_s2 + $0x220] sm:$0xff]  ;;  %v101_v41 = vld [vmem:[%s2492_s2 + $0x230] sm:$0xff] }
  0x19   :  { %v1239_v40 = vpack.c.bf16 %v102_v33, %v98_v32  ;;  %v104_v42 = vld [vmem:[%s2492_s2 + $0x248] sm:$0xff]  ;;  %v106_v44 = vld [vmem:[%s2492_s2 + $0x258] sm:$0xff]  ;;  %v1113_v46 = vpack.c.bf16 %v99_v38, %v95_v37  ;;  %v1241_v47 = vpack.c.bf16 %v101_v41, %v97_v39  ;;  %v103_v49 = vld [vmem:[%s2492_s2 + $0x240] sm:$0xff] }
  0x1a   :  { %1102 = vmatpush1.bf16.msra.mxu0 %v1101_v10  ;;  %v108_v43 = vld [vmem:[%s2492_s2 + $0x268] sm:$0xff]  ;;  %v110_v45 = vld [vmem:[%s2492_s2 + $0x278] sm:$0xff]  ;;  %v107_v50 = vld [vmem:[%s2492_s2 + $0x260] sm:$0xff] }
  0x1b   :  { %1230 = vmatpush1.bf16.msra.mxu1 %v1229_v11  ;;  %1104 = vmatprep.subr.bf16.mxu0 %v1103_v12  ;;  %v1115_v48 = vpack.c.bf16 %v108_v43, %v104_v42  ;;  %v105_v51 = vld [vmem:[%s2492_s2 + $0x250] sm:$0xff]  ;;  %v1243_v52 = vpack.c.bf16 %v110_v45, %v106_v44  ;;  %v112_v54 = vld [vmem:[%s2492_s2 + $0x288] sm:$0xff]  ;;  %v114_v56 = vld [vmem:[%s2492_s2 + $0x298] sm:$0xff]  ;;  %v1117_v58 = vpack.c.bf16 %v107_v50, %v103_v49 }
  0x1c   :  { %1232 = vmatprep.subr.bf16.mxu1 %v1231_v16  ;;  %v109_v53 = vld [vmem:[%s2492_s2 + $0x270] sm:$0xff]  ;;  %v116_v55 = vld [vmem:[%s2492_s2 + $0x2a8] sm:$0xff]  ;;  %v118_v57 = vld [vmem:[%s2492_s2 + $0x2b8] sm:$0xff] }
  0x1d   :  { %v1245_v59 = vpack.c.bf16 %v109_v53, %v105_v51  ;;  %v1119_v60 = vpack.c.bf16 %v116_v55, %v112_v54  ;;  %v111_v61 = vld [vmem:[%s2492_s2 + $0x280] sm:$0xff]  ;;  %v113_v63 = vld [vmem:[%s2492_s2 + $0x290] sm:$0xff]  ;;  %v1247_v0 = vpack.c.bf16 %v118_v57, %v114_v56  ;;  %v120_v2 = vld [vmem:[%s2492_s2 + $0x2c8] sm:$0xff] }
  0x1e   :  { %1106 = vmatpush1.bf16.msra.mxu0 %v1105_v22  ;;  %v115_v62 = vld [vmem:[%s2492_s2 + $0x2a0] sm:$0xff]  ;;  %v117_v1 = vld [vmem:[%s2492_s2 + $0x2b0] sm:$0xff]  ;;  %v124_v3 = vld [vmem:[%s2492_s2 + $0x2e8] sm:$0xff] }
  0x1f   :  { %1234 = vmatpush1.bf16.msra.mxu1 %v1233_v23  ;;  %1108 = vmatprep.subr.bf16.mxu0 %v1107_v24  ;;  %v122_v4 = vld [vmem:[%s2492_s2 + $0x2d8] sm:$0xff]  ;;  %v1121_v6 = vpack.c.bf16 %v115_v62, %v111_v61  ;;  %v119_v7 = vld [vmem:[%s2492_s2 + $0x2c0] sm:$0xff]  ;;  %v1249_v8 = vpack.c.bf16 %v117_v1, %v113_v63  ;;  %v1123_v9 = vpack.c.bf16 %v124_v3, %v120_v2  ;;  %v121_v11 = vld [vmem:[%s2492_s2 + $0x2d0] sm:$0xff] }
  0x20   :  { %1236 = vmatprep.subr.bf16.mxu1 %v1235_v28  ;;  %v126_v5 = vld [vmem:[%s2492_s2 + $0x2f8] sm:$0xff]  ;;  %v123_v10 = vld [vmem:[%s2492_s2 + $0x2e0] sm:$0xff]  ;;  %v125_v12 = vld [vmem:[%s2492_s2 + $0x2f0] sm:$0xff] }
  0x21   :  { %v1251_v13 = vpack.c.bf16 %v126_v5, %v122_v4  ;;  %v128_v14 = vld [vmem:[%s2492_s2 + $0x308] sm:$0xff]  ;;  %v130_v17 = vld [vmem:[%s2492_s2 + $0x318] sm:$0xff]  ;;  %v1125_v19 = vpack.c.bf16 %v123_v10, %v119_v7  ;;  %v1253_v20 = vpack.c.bf16 %v125_v12, %v121_v11  ;;  %v127_v22 = vld [vmem:[%s2492_s2 + $0x300] sm:$0xff] }
  0x22   :  { %1110 = vmatpush1.bf16.msra.mxu0 %v1109_v34  ;;  %v132_v15 = vld [vmem:[%s2492_s2 + $0x328] sm:$0xff]  ;;  %v134_v18 = vld [vmem:[%s2492_s2 + $0x338] sm:$0xff]  ;;  %v131_v23 = vld [vmem:[%s2492_s2 + $0x320] sm:$0xff] }
  0x23   :  { %1238 = vmatpush1.bf16.msra.mxu1 %v1237_v35  ;;  %1112 = vmatprep.subr.bf16.mxu0 %v1111_v36  ;;  %v24_v16 = vld [vmem:[%s2493_s1 + $0x8] sm:$0xff]  ;;  %v1127_v21 = vpack.c.bf16 %v132_v15, %v128_v14  ;;  %v129_v24 = vld [vmem:[%s2492_s2 + $0x310] sm:$0xff]  ;;  %v1255_v25 = vpack.c.bf16 %v134_v18, %v130_v17  ;;  %v138_v29 = vld [vmem:[%s2492_s2 + $0x358] sm:$0xff]  ;;  %v1129_v31 = vpack.c.bf16 %v131_v23, %v127_v22 }
  0x24   :  { %1240 = vmatprep.subr.bf16.mxu1 %v1239_v40  ;;  %373 = vmatprep.mubr.f32.mxu0 %v24_v16  ;;  %v133_v26 = vld [vmem:[%s2492_s2 + $0x330] sm:$0xff]  ;;  %v136_v27 = vld [vmem:[%s2492_s2 + $0x348] sm:$0xff]  ;;  %v142_v30 = vld [vmem:[%s2492_s2 + $0x378] sm:$0xff] }
  0x25   :  { %527 = vmatprep.mubr.f32.mxu1 %v24_v16  ;;  %v140_v28 = vld [vmem:[%s2492_s2 + $0x368] sm:$0xff]  ;;  %v1257_v32 = vpack.c.bf16 %v133_v26, %v129_v24  ;;  %v135_v34 = vld [vmem:[%s2492_s2 + $0x340] sm:$0xff]  ;;  %v137_v36 = vld [vmem:[%s2492_s2 + $0x350] sm:$0xff]  ;;  %v1259_v37 = vpack.c.bf16 %v142_v30, %v138_v29 }
  0x26   :  { %1114 = vmatpush1.bf16.msra.mxu0 %v1113_v46  ;;  %v1131_v33 = vpack.c.bf16 %v140_v28, %v136_v27  ;;  %v139_v35 = vld [vmem:[%s2492_s2 + $0x360] sm:$0xff]  ;;  %v141_v38 = vld [vmem:[%s2492_s2 + $0x370] sm:$0xff]  ;;  %v144_v39 = vld [vmem:[%s2492_s2 + $0x388] sm:$0xff] }
  0x27   :  { %1242 = vmatpush1.bf16.msra.mxu1 %v1241_v47  ;;  %1116 = vmatprep.subr.bf16.mxu0 %v1115_v48  ;;  %v148_v40 = vld [vmem:[%s2492_s2 + $0x3a8] sm:$0xff]  ;;  %v146_v41 = vld [vmem:[%s2492_s2 + $0x398] sm:$0xff]  ;;  %v1133_v43 = vpack.c.bf16 %v139_v35, %v135_v34  ;;  %v1261_v44 = vpack.c.bf16 %v141_v38, %v137_v36  ;;  %v143_v46 = vld [vmem:[%s2492_s2 + $0x380] sm:$0xff] }
  0x28   :  { %1244 = vmatprep.subr.bf16.mxu1 %v1243_v52  ;;  %v150_v42 = vld [vmem:[%s2492_s2 + $0x3b8] sm:$0xff]  ;;  %v1135_v45 = vpack.c.bf16 %v148_v40, %v144_v39  ;;  %v147_v47 = vld [vmem:[%s2492_s2 + $0x3a0] sm:$0xff]  ;;  %v145_v48 = vld [vmem:[%s2492_s2 + $0x390] sm:$0xff] }
  0x29   :  { %v1263_v49 = vpack.c.bf16 %v150_v42, %v146_v41  ;;  %v149_v50 = vld [vmem:[%s2492_s2 + $0x3b0] sm:$0xff]  ;;  %v152_v51 = vld [vmem:[%s2492_s2 + $0x3c8] sm:$0xff]  ;;  %v154_v53 = vld [vmem:[%s2492_s2 + $0x3d8] sm:$0xff]  ;;  %v1137_v55 = vpack.c.bf16 %v147_v47, %v143_v46 }
  0x2a   :  { %1118 = vmatpush1.bf16.msra.mxu0 %v1117_v58  ;;  %v156_v52 = vld [vmem:[%s2492_s2 + $0x3e8] sm:$0xff]  ;;  %v158_v54 = vld [vmem:[%s2492_s2 + $0x3f8] sm:$0xff]  ;;  %v1265_v56 = vpack.c.bf16 %v149_v50, %v145_v48  ;;  %v151_v58 = vld [vmem:[%s2492_s2 + $0x3c0] sm:$0xff] }
  0x2b   :  { %1246 = vmatpush1.bf16.msra.mxu1 %v1245_v59  ;;  %1120 = vmatprep.subr.bf16.mxu0 %v1119_v60  ;;  %v1139_v57 = vpack.c.bf16 %v156_v52, %v152_v51  ;;  %v155_v59 = vld [vmem:[%s2492_s2 + $0x3e0] sm:$0xff]  ;;  %v153_v60 = vld [vmem:[%s2492_s2 + $0x3d0] sm:$0xff]  ;;  %v1267_v61 = vpack.c.bf16 %v158_v54, %v154_v53  ;;  %v160_v63 = vld [vmem:[%s2492_s2 + $0x408] sm:$0xff] }
  0x2c   :  { %1248 = vmatprep.subr.bf16.mxu1 %v1247_v0  ;;  %v157_v62 = vld [vmem:[%s2492_s2 + $0x3f0] sm:$0xff]  ;;  %v164_v0 = vld [vmem:[%s2492_s2 + $0x428] sm:$0xff]  ;;  %v162_v1 = vld [vmem:[%s2492_s2 + $0x418] sm:$0xff]  ;;  %v1141_v3 = vpack.c.bf16 %v155_v59, %v151_v58 }
  0x2d   :  { %v166_v2 = vld [vmem:[%s2492_s2 + $0x438] sm:$0xff]  ;;  %v1269_v4 = vpack.c.bf16 %v157_v62, %v153_v60  ;;  %v1143_v5 = vpack.c.bf16 %v164_v0, %v160_v63  ;;  %v163_v7 = vld [vmem:[%s2492_s2 + $0x420] sm:$0xff]  ;;  %v165_v10 = vld [vmem:[%s2492_s2 + $0x430] sm:$0xff] }
  0x2e   :  { %1122 = vmatpush1.bf16.msra.mxu0 %v1121_v6  ;;  %v159_v6 = vld [vmem:[%s2492_s2 + $0x400] sm:$0xff]  ;;  %v168_v11 = vld [vmem:[%s2492_s2 + $0x448] sm:$0xff]  ;;  %v174_v14 = vld [vmem:[%s2492_s2 + $0x478] sm:$0xff] }
  0x2f   :  { %1250 = vmatpush1.bf16.msra.mxu1 %v1249_v8  ;;  %1124 = vmatprep.subr.bf16.mxu0 %v1123_v9  ;;  %v161_v8 = vld [vmem:[%s2492_s2 + $0x410] sm:$0xff]  ;;  %v1271_v9 = vpack.c.bf16 %v166_v2, %v162_v1  ;;  %v172_v12 = vld [vmem:[%s2492_s2 + $0x468] sm:$0xff]  ;;  %v23_v15 = vld [vmem:[%s2493_s1] sm:$0xff]  ;;  %v1145_v16 = vpack.c.bf16 %v163_v7, %v159_v6 }
  0x30   :  { %1252 = vmatprep.subr.bf16.mxu1 %v1251_v13  ;;  %v170_v13 = vld [vmem:[%s2492_s2 + $0x458] sm:$0xff]  ;;  %v1273_v17 = vpack.c.bf16 %v165_v10, %v161_v8  ;;  %v1147_v18 = vpack.c.bf16 %v172_v12, %v168_v11  ;;  %v173_v23 = vld [vmem:[%s2492_s2 + $0x470] sm:$0xff]  ;;  %v176_v24 = vld [vmem:[%s2492_s2 + $0x488] sm:$0xff] }
  0x31   :  { %v1275_v22 = vpack.c.bf16 %v174_v14, %v170_v13  ;;  %v178_v26 = vld [vmem:[%s2492_s2 + $0x498] sm:$0xff]  ;;  %v181_v35 = vld [vmem:[%s2492_s2 + $0x4b0] sm:$0xff]  ;;  %v184_v36 = vld [vmem:[%s2492_s2 + $0x4c8] sm:$0xff] }
  0x32   :  { %1126 = vmatpush1.bf16.msra.mxu0 %v1125_v19  ;;  %v167_v19 = vld [vmem:[%s2492_s2 + $0x440] sm:$0xff]  ;;  %v182_v27 = vld [vmem:[%s2492_s2 + $0x4b8] sm:$0xff]  ;;  %v189_v47 = vld [vmem:[%s2492_s2 + $0x4f0] sm:$0xff] }
  0x33   :  { %1254 = vmatpush1.bf16.msra.mxu1 %v1253_v20  ;;  %1128 = vmatprep.subr.bf16.mxu0 %v1127_v21  ;;  %v171_v20 = vld [vmem:[%s2492_s2 + $0x460] sm:$0xff]  ;;  %v169_v21 = vld [vmem:[%s2492_s2 + $0x450] sm:$0xff]  ;;  %v1279_v34 = vpack.c.bf16 %v182_v27, %v178_v26  ;;  %v186_v38 = vld [vmem:[%s2492_s2 + $0x4d8] sm:$0xff] }
  0x34   :  { %1256 = vmatprep.subr.bf16.mxu1 %v1255_v25  ;;  %v180_v25 = vld [vmem:[%s2492_s2 + $0x4a8] sm:$0xff]  ;;  %v1149_v28 = vpack.c.bf16 %v171_v20, %v167_v19  ;;  %v1277_v29 = vpack.c.bf16 %v173_v23, %v169_v21  ;;  %v190_v39 = vld [vmem:[%s2492_s2 + $0x4f8] sm:$0xff]  ;;  %v197_v59 = vld [vmem:[%s2492_s2 + $0x530] sm:$0xff] }
  0x35   :  { %v1151_v30 = vpack.c.bf16 %v180_v25, %v176_v24  ;;  %v1283_v46 = vpack.c.bf16 %v190_v39, %v186_v38  ;;  %v192_v48 = vld [vmem:[%s2492_s2 + $0x508] sm:$0xff]  ;;  %v194_v50 = vld [vmem:[%s2492_s2 + $0x518] sm:$0xff]  ;;  %v205_v7 = vld [vmem:[%s2492_s2 + $0x570] sm:$0xff] }
  0x36   :  { %1130 = vmatpush1.bf16.msra.mxu0 %v1129_v31  ;;  %v175_v31 = vld [vmem:[%s2492_s2 + $0x480] sm:$0xff]  ;;  %v198_v51 = vld [vmem:[%s2492_s2 + $0x538] sm:$0xff]  ;;  %v200_v60 = vld [vmem:[%s2492_s2 + $0x548] sm:$0xff] }
  0x37   :  { %1258 = vmatpush1.bf16.msra.mxu1 %v1257_v32  ;;  %1132 = vmatprep.subr.bf16.mxu0 %v1131_v33  ;;  %v179_v32 = vld [vmem:[%s2492_s2 + $0x4a0] sm:$0xff]  ;;  %v177_v33 = vld [vmem:[%s2492_s2 + $0x490] sm:$0xff]  ;;  %v1287_v58 = vpack.c.bf16 %v198_v51, %v194_v50  ;;  %v202_v62 = vld [vmem:[%s2492_s2 + $0x558] sm:$0xff] }
  0x38   :  { %1260 = vmatprep.subr.bf16.mxu1 %v1259_v37  ;;  %v188_v37 = vld [vmem:[%s2492_s2 + $0x4e8] sm:$0xff]  ;;  %v1153_v40 = vpack.c.bf16 %v179_v32, %v175_v31  ;;  %v1281_v41 = vpack.c.bf16 %v181_v35, %v177_v33  ;;  %v206_v63 = vld [vmem:[%s2492_s2 + $0x578] sm:$0xff]  ;;  %v207_v14 = vld [vmem:[%s2492_s2 + $0x580] sm:$0xff] }
  0x39   :  { %v1155_v42 = vpack.c.bf16 %v188_v37, %v184_v36  ;;  %v1291_v6 = vpack.c.bf16 %v206_v63, %v202_v62  ;;  %v208_v8 = vld [vmem:[%s2492_s2 + $0x588] sm:$0xff]  ;;  %v210_v10 = vld [vmem:[%s2492_s2 + $0x598] sm:$0xff]  ;;  %v209_v19 = vld [vmem:[%s2492_s2 + $0x590] sm:$0xff] }
  0x3a   :  { %1134 = vmatpush1.bf16.msra.mxu0 %v1133_v43  ;;  %v183_v43 = vld [vmem:[%s2492_s2 + $0x4c0] sm:$0xff]  ;;  %v214_v11 = vld [vmem:[%s2492_s2 + $0x5b8] sm:$0xff]  ;;  %v28_v12 = vld [vmem:[%s2493_s1 + $0x28] sm:$0xff] }
  0x3b   :  { %1262 = vmatpush1.bf16.msra.mxu1 %v1261_v44  ;;  %1136 = vmatprep.subr.bf16.mxu0 %v1135_v45  ;;  %v187_v44 = vld [vmem:[%s2492_s2 + $0x4e0] sm:$0xff]  ;;  %v185_v45 = vld [vmem:[%s2492_s2 + $0x4d0] sm:$0xff]  ;;  %v1295_v21 = vpack.c.bf16 %v214_v11, %v210_v10  ;;  %v220_v23 = vld [vmem:[%s2492_s2 + $0x5e8] sm:$0xff] }
  0x3c   :  { %1264 = vmatprep.subr.bf16.mxu1 %v1263_v49  ;;  %v196_v49 = vld [vmem:[%s2492_s2 + $0x528] sm:$0xff]  ;;  %v1157_v52 = vpack.c.bf16 %v187_v44, %v183_v43  ;;  %v1285_v53 = vpack.c.bf16 %v189_v47, %v185_v45  ;;  %v213_v20 = vld [vmem:[%s2492_s2 + $0x5b0] sm:$0xff]  ;;  %v26_v24 = vld [vmem:[%s2493_s1 + $0x18] sm:$0xff] }
  0x3d   :  { %v1159_v54 = vpack.c.bf16 %v196_v49, %v192_v48  ;;  %v218_v25 = vld [vmem:[%s2492_s2 + $0x5d8] sm:$0xff]  ;;  %v219_v31 = vld [vmem:[%s2492_s2 + $0x5e0] sm:$0xff]  ;;  %v217_v32 = vld [vmem:[%s2492_s2 + $0x5d0] sm:$0xff] }
  0x3e   :  { %1138 = vmatpush1.bf16.msra.mxu0 %v1137_v55  ;;  %v191_v55 = vld [vmem:[%s2492_s2 + $0x500] sm:$0xff]  ;;  %v222_v26 = vld [vmem:[%s2492_s2 + $0x5f8] sm:$0xff]  ;;  %v224_v35 = vld [vmem:[%s2492_s2 + $0x608] sm:$0xff] }
  0x3f   :  { %1266 = vmatpush1.bf16.msra.mxu1 %v1265_v56  ;;  %1140 = vmatprep.subr.bf16.mxu0 %v1139_v57  ;;  %v195_v56 = vld [vmem:[%s2492_s2 + $0x520] sm:$0xff]  ;;  %v193_v57 = vld [vmem:[%s2492_s2 + $0x510] sm:$0xff]  ;;  %v1299_v33 = vpack.c.bf16 %v222_v26, %v218_v25  ;;  %v228_v36 = vld [vmem:[%s2492_s2 + $0x628] sm:$0xff] }
  0x40   :  { %1268 = vmatprep.subr.bf16.mxu1 %v1267_v61  ;;  %v204_v61 = vld [vmem:[%s2492_s2 + $0x568] sm:$0xff]  ;;  %v1161_v0 = vpack.c.bf16 %v195_v56, %v191_v55  ;;  %v1289_v1 = vpack.c.bf16 %v197_v59, %v193_v57  ;;  %v226_v37 = vld [vmem:[%s2492_s2 + $0x618] sm:$0xff]  ;;  %v227_v43 = vld [vmem:[%s2492_s2 + $0x620] sm:$0xff] }
  0x41   :  { %v1163_v2 = vpack.c.bf16 %v204_v61, %v200_v60  ;;  %v230_v38 = vld [vmem:[%s2492_s2 + $0x638] sm:$0xff]  ;;  %v225_v44 = vld [vmem:[%s2492_s2 + $0x610] sm:$0xff]  ;;  %v232_v47 = vld [vmem:[%s2492_s2 + $0x648] sm:$0xff] }
  0x42   :  { %1142 = vmatpush1.bf16.msra.mxu0 %v1141_v3  ;;  %v199_v3 = vld [vmem:[%s2492_s2 + $0x540] sm:$0xff]  ;;  %v1303_v45 = vpack.c.bf16 %v230_v38, %v226_v37  ;;  %v236_v48 = vld [vmem:[%s2492_s2 + $0x668] sm:$0xff]  ;;  %v234_v49 = vld [vmem:[%s2492_s2 + $0x658] sm:$0xff] }
  0x43   :  { %1270 = vmatpush1.bf16.msra.mxu1 %v1269_v4  ;;  %1144 = vmatprep.subr.bf16.mxu0 %v1143_v5  ;;  %v203_v4 = vld [vmem:[%s2492_s2 + $0x560] sm:$0xff]  ;;  %v201_v5 = vld [vmem:[%s2492_s2 + $0x550] sm:$0xff]  ;;  %v238_v50 = vld [vmem:[%s2492_s2 + $0x678] sm:$0xff] }
  0x44   :  { %1272 = vmatprep.subr.bf16.mxu1 %v1271_v9  ;;  %v212_v9 = vld [vmem:[%s2492_s2 + $0x5a8] sm:$0xff]  ;;  %v1165_v13 = vpack.c.bf16 %v203_v4, %v199_v3  ;;  %v235_v55 = vld [vmem:[%s2492_s2 + $0x660] sm:$0xff]  ;;  %v233_v56 = vld [vmem:[%s2492_s2 + $0x650] sm:$0xff]  ;;  %v1307_v57 = vpack.c.bf16 %v238_v50, %v234_v49 }
  0x45   :  { %374 = vmatmul.mubr.f32.vlgmr.msra.gmra.mrb[0].mxu0 %v23_v15  ;;  %v240_v59 = vld [vmem:[%s2492_s2 + $0x688] sm:$0xff]  ;;  %v242_v61 = vld [vmem:[%s2492_s2 + $0x698] sm:$0xff]  ;;  %v243_v3 = vld [vmem:[%s2492_s2 + $0x6a0] sm:$0xff] }
  0x46   :  { %1146 = vmatpush1.bf16.msra.mxu0 %v1145_v16  ;;  %528 = vmatmul.mubr.f32.vlgmr.msra.gmra.mrb[0].mxu1 %v23_v15  ;;  %v27_v15 = vld [vmem:[%s2493_s1 + $0x20] sm:$0xff]  ;;  %v1293_v16 = vpack.c.bf16 %v205_v7, %v201_v5  ;;  %v244_v60 = vld [vmem:[%s2492_s2 + $0x6a8] sm:$0xff]  ;;  %v246_v62 = vld [vmem:[%s2492_s2 + $0x6b8] sm:$0xff] }
  0x47   :  { %1274 = vmatpush1.bf16.msra.mxu1 %v1273_v17  ;;  %1148 = vmatprep.subr.bf16.mxu0 %v1147_v18  ;;  %v1167_v17 = vpack.c.bf16 %v212_v9, %v208_v8  ;;  %v211_v18 = vld [vmem:[%s2492_s2 + $0x5a0] sm:$0xff]  ;;  %v241_v4 = vld [vmem:[%s2492_s2 + $0x690] sm:$0xff]  ;;  %v1311_v5 = vpack.c.bf16 %v246_v62, %v242_v61  ;;  %v248_v7 = vld [vmem:[%s2492_s2 + $0x6c8] sm:$0xff] }
  0x48   :  { %1276 = vmatprep.subr.bf16.mxu1 %v1275_v22  ;;  %379 = vmatprep.mubr.f32.mxu0 %v28_v12  ;;  %v216_v22 = vld [vmem:[%s2492_s2 + $0x5c8] sm:$0xff]  ;;  %v1169_v27 = vpack.c.bf16 %v211_v18, %v207_v14  ;;  %v250_v9 = vld [vmem:[%s2492_s2 + $0x6d8] sm:$0xff]  ;;  %v247_v14 = vld [vmem:[%s2492_s2 + $0x6c0] sm:$0xff] }
  0x49   :  { %533 = vmatprep.mubr.f32.mxu1 %v28_v12  ;;  %380 = vmatmul.mubr.f32.gmra.mrb[2].mxu0 %v27_v15  ;;  %v252_v8 = vld [vmem:[%s2492_s2 + $0x6e8] sm:$0xff]  ;;  %v254_v10 = vld [vmem:[%s2492_s2 + $0x6f8] sm:$0xff]  ;;  %v253_v18 = vld [vmem:[%s2492_s2 + $0x6f0] sm:$0xff] }
  0x4a   :  { %1150 = vmatpush1.bf16.msra.mxu0 %v1149_v28  ;;  %534 = vmatmul.mubr.f32.gmra.mrb[2].mxu1 %v27_v15  ;;  %v1297_v28 = vpack.c.bf16 %v213_v20, %v209_v19  ;;  %v251_v15 = vld [vmem:[%s2492_s2 + $0x6e0] sm:$0xff]  ;;  %v256_v19 = vld [vmem:[%s2492_s2 + $0x708] sm:$0xff] }
  0x4b   :  { %1278 = vmatpush1.bf16.msra.mxu1 %v1277_v29  ;;  %1152 = vmatprep.subr.bf16.mxu0 %v1151_v30  ;;  %v1171_v29 = vpack.c.bf16 %v220_v23, %v216_v22  ;;  %v215_v30 = vld [vmem:[%s2492_s2 + $0x5c0] sm:$0xff]  ;;  %v260_v20 = vld [vmem:[%s2492_s2 + $0x728] sm:$0xff]  ;;  %v262_v22 = vld [vmem:[%s2492_s2 + $0x738] sm:$0xff]  ;;  %v1189_v23 = vpack.c.bf16 %v251_v15, %v247_v14 }
  0x4c   :  { %1280 = vmatprep.subr.bf16.mxu1 %v1279_v34  ;;  %450 = vmatprep.mubr.f32.mxu0 %v26_v24  ;;  %v221_v34 = vld [vmem:[%s2492_s2 + $0x5f0] sm:$0xff]  ;;  %v1173_v39 = vpack.c.bf16 %v219_v31, %v215_v30  ;;  %v1191_v25 = vpack.c.bf16 %v260_v20, %v256_v19  ;;  %v255_v26 = vld [vmem:[%s2492_s2 + $0x700] sm:$0xff]  ;;  %v264_v31 = vld [vmem:[%s2492_s2 + $0x748] sm:$0xff] }
  0x4d   :  { %604 = vmatprep.mubr.f32.mxu1 %v26_v24  ;;  %v261_v30 = vld [vmem:[%s2492_s2 + $0x730] sm:$0xff]  ;;  %v263_v38 = vld [vmem:[%s2492_s2 + $0x740] sm:$0xff]  ;;  %v674_v14 = vld [vmem:[%s2494_s4 + $0x8] sm:$0xff] }
  0x4e   :  { %1154 = vmatpush1.bf16.msra.mxu0 %v1153_v40  ;;  %v1301_v40 = vpack.c.bf16 %v221_v34, %v217_v32  ;;  %v268_v32 = vld [vmem:[%s2492_s2 + $0x768] sm:$0xff]  ;;  %v270_v34 = vld [vmem:[%s2492_s2 + $0x778] sm:$0xff]  ;;  %v271_v50 = vld [vmem:[%s2492_s2 + $0x780] sm:$0xff] }
  0x4f   :  { %1282 = vmatpush1.bf16.msra.mxu1 %v1281_v41  ;;  %1156 = vmatprep.subr.bf16.mxu0 %v1155_v42  ;;  %v1175_v41 = vpack.c.bf16 %v228_v36, %v224_v35  ;;  %v223_v42 = vld [vmem:[%s2492_s2 + $0x600] sm:$0xff]  ;;  %v1195_v37 = vpack.c.bf16 %v268_v32, %v264_v31  ;;  %v691_v20 = vld [vmem:[%s2494_s4 + $0x90] sm:$0xff] }
  0x50   :  { %1284 = vmatprep.subr.bf16.mxu1 %v1283_v46  ;;  %v229_v46 = vld [vmem:[%s2492_s2 + $0x630] sm:$0xff]  ;;  %v1177_v51 = vpack.c.bf16 %v227_v43, %v223_v42  ;;  %v272_v43 = vld [vmem:[%s2492_s2 + $0x788] sm:$0xff]  ;;  %v279_v62 = vld [vmem:[%s2492_s2 + $0x7c0] sm:$0xff] }
  0x51   :  { %v269_v42 = vld [vmem:[%s2492_s2 + $0x770] sm:$0xff]  ;;  %v693_v32 = vld [vmem:[%s2494_s4 + $0xa0] sm:$0xff] }
  0x52   :  { %1158 = vmatpush1.bf16.msra.mxu0 %v1157_v52  ;;  %v1305_v52 = vpack.c.bf16 %v229_v46, %v225_v44  ;;  %v276_v44 = vld [vmem:[%s2492_s2 + $0x7a8] sm:$0xff]  ;;  %v278_v46 = vld [vmem:[%s2492_s2 + $0x7b8] sm:$0xff] }
  0x53   :  { %1286 = vmatpush1.bf16.msra.mxu1 %v1285_v53  ;;  %1160 = vmatprep.subr.bf16.mxu0 %v1159_v54  ;;  %v1179_v53 = vpack.c.bf16 %v236_v48, %v232_v47  ;;  %v231_v54 = vld [vmem:[%s2492_s2 + $0x640] sm:$0xff]  ;;  %v1199_v49 = vpack.c.bf16 %v276_v44, %v272_v43  ;;  %v695_v44 = vld [vmem:[%s2494_s4 + $0xb0] sm:$0xff] }
  0x54   :  { %1288 = vmatprep.subr.bf16.mxu1 %v1287_v58  ;;  %v237_v58 = vld [vmem:[%s2492_s2 + $0x670] sm:$0xff]  ;;  %v1181_v63 = vpack.c.bf16 %v235_v55, %v231_v54  ;;  %v280_v55 = vld [vmem:[%s2492_s2 + $0x7c8] sm:$0xff] }
  0x55   :  { %v277_v54 = vld [vmem:[%s2492_s2 + $0x7b0] sm:$0xff] }
  0x56   :  { %1162 = vmatpush1.bf16.msra.mxu0 %v1161_v0  ;;  %v1309_v0 = vpack.c.bf16 %v237_v58, %v233_v56  ;;  %v284_v56 = vld [vmem:[%s2492_s2 + $0x7e8] sm:$0xff]  ;;  %v286_v58 = vld [vmem:[%s2492_s2 + $0x7f8] sm:$0xff] }
  0x57   :  { %1290 = vmatpush1.bf16.msra.mxu1 %v1289_v1  ;;  %1164 = vmatprep.subr.bf16.mxu0 %v1163_v2  ;;  %v1183_v1 = vpack.c.bf16 %v244_v60, %v240_v59  ;;  %v239_v2 = vld [vmem:[%s2492_s2 + $0x680] sm:$0xff]  ;;  %v1203_v61 = vpack.c.bf16 %v284_v56, %v280_v55 }
  0x58   :  { %1292 = vmatprep.subr.bf16.mxu1 %v1291_v6  ;;  %v245_v6 = vld [vmem:[%s2492_s2 + $0x6b0] sm:$0xff]  ;;  %v1185_v11 = vpack.c.bf16 %v243_v3, %v239_v2  ;;  %v697_v56 = vld [vmem:[%s2494_s4 + $0xc0] sm:$0xff] }
  0x59   :  { %v1313_v12 = vpack.c.bf16 %v245_v6, %v241_v4  ;;  %v285_v2 = vld [vmem:[%s2492_s2 + $0x7f0] sm:$0xff]  ;;  %v30_v6 = vld [vmem:[%s2493_s1 + $0x38] sm:$0xff] }
  0x5a   :  { %1166 = vmatpush1.bf16.msra.mxu0 %v1165_v13  ;;  %v1187_v13 = vpack.c.bf16 %v252_v8, %v248_v7  ;;  %v29_v7 = vld [vmem:[%s2493_s1 + $0x30] sm:$0xff]  ;;  %v689_v8 = vld [vmem:[%s2494_s4 + $0x80] sm:$0xff] }
  0x5b   :  { %1294 = vmatpush1.bf16.msra.mxu1 %v1293_v16  ;;  %1168 = vmatprep.subr.bf16.mxu0 %v1167_v17  ;;  %v249_v16 = vld [vmem:[%s2492_s2 + $0x6d0] sm:$0xff]  ;;  %v1315_v17 = vpack.c.bf16 %v254_v10, %v250_v9  ;;  %v690_v9 = vld [vmem:[%s2494_s4 + $0x88] sm:$0xff]  ;;  %v721_v10 = vld [vmem:[%s2494_s4 + $0x180] sm:$0xff] }
  0x5c   :  { %1296 = vmatprep.subr.bf16.mxu1 %v1295_v21  ;;  %v258_v21 = vld [vmem:[%s2492_s2 + $0x718] sm:$0xff]  ;;  %v1317_v24 = vpack.c.bf16 %v253_v18, %v249_v16  ;;  %v706_v18 = vld [vmem:[%s2494_s4 + $0x108] sm:$0xff] }
  0x5e   :  { %1170 = vmatpush1.bf16.msra.mxu0 %v1169_v27  ;;  %v259_v27 = vld [vmem:[%s2492_s2 + $0x720] sm:$0xff] }
  0x5f   :  { %1298 = vmatpush1.bf16.msra.mxu1 %v1297_v28  ;;  %1172 = vmatprep.subr.bf16.mxu0 %v1171_v29  ;;  %v257_v28 = vld [vmem:[%s2492_s2 + $0x710] sm:$0xff]  ;;  %v1319_v29 = vpack.c.bf16 %v262_v22, %v258_v21  ;;  %v1193_v35 = vpack.c.bf16 %v259_v27, %v255_v26  ;;  %v692_v21 = vld [vmem:[%s2494_s4 + $0x98] sm:$0xff] }
  0x60   :  { %1300 = vmatprep.subr.bf16.mxu1 %v1299_v33  ;;  %v266_v33 = vld [vmem:[%s2492_s2 + $0x758] sm:$0xff]  ;;  %v1321_v36 = vpack.c.bf16 %v261_v30, %v257_v28  ;;  %v723_v22 = vld [vmem:[%s2494_s4 + $0x190] sm:$0xff] }
  0x61   :  { %v676_v26 = vld [vmem:[%s2494_s4 + $0x18] sm:$0xff] }
  0x62   :  { %1174 = vmatpush1.bf16.msra.mxu0 %v1173_v39  ;;  %v267_v39 = vld [vmem:[%s2492_s2 + $0x760] sm:$0xff]  ;;  %v708_v30 = vld [vmem:[%s2494_s4 + $0x118] sm:$0xff] }
  0x63   :  { %1302 = vmatpush1.bf16.msra.mxu1 %v1301_v40  ;;  %1176 = vmatprep.subr.bf16.mxu0 %v1175_v41  ;;  %v265_v40 = vld [vmem:[%s2492_s2 + $0x750] sm:$0xff]  ;;  %v1323_v41 = vpack.c.bf16 %v270_v34, %v266_v33  ;;  %v1197_v47 = vpack.c.bf16 %v267_v39, %v263_v38  ;;  %v694_v33 = vld [vmem:[%s2494_s4 + $0xa8] sm:$0xff]  ;;  %v725_v34 = vld [vmem:[%s2494_s4 + $0x1a0] sm:$0xff] }
  0x64   :  { %1304 = vmatprep.subr.bf16.mxu1 %v1303_v45  ;;  %v274_v45 = vld [vmem:[%s2492_s2 + $0x798] sm:$0xff]  ;;  %v1325_v48 = vpack.c.bf16 %v269_v42, %v265_v40  ;;  %v678_v38 = vld [vmem:[%s2494_s4 + $0x28] sm:$0xff] }
  0x65   :  { %v710_v42 = vld [vmem:[%s2494_s4 + $0x128] sm:$0xff] }
  0x66   :  { %1178 = vmatpush1.bf16.msra.mxu0 %v1177_v51  ;;  %v275_v51 = vld [vmem:[%s2492_s2 + $0x7a0] sm:$0xff] }
  0x67   :  { %1306 = vmatpush1.bf16.msra.mxu1 %v1305_v52  ;;  %1180 = vmatprep.subr.bf16.mxu0 %v1179_v53  ;;  %v273_v52 = vld [vmem:[%s2492_s2 + $0x790] sm:$0xff]  ;;  %v1327_v53 = vpack.c.bf16 %v278_v46, %v274_v45  ;;  %v1201_v59 = vpack.c.bf16 %v275_v51, %v271_v50  ;;  %v696_v45 = vld [vmem:[%s2494_s4 + $0xb8] sm:$0xff] }
  0x68   :  { %1308 = vmatprep.subr.bf16.mxu1 %v1307_v57  ;;  %v282_v57 = vld [vmem:[%s2492_s2 + $0x7d8] sm:$0xff]  ;;  %v1329_v60 = vpack.c.bf16 %v277_v54, %v273_v52  ;;  %v727_v46 = vld [vmem:[%s2494_s4 + $0x1b0] sm:$0xff] }
  0x69   :  { %v680_v50 = vld [vmem:[%s2494_s4 + $0x38] sm:$0xff] }
  0x6a   :  { %1182 = vmatpush1.bf16.msra.mxu0 %v1181_v63  ;;  %v283_v63 = vld [vmem:[%s2492_s2 + $0x7e0] sm:$0xff]  ;;  %v712_v54 = vld [vmem:[%s2494_s4 + $0x138] sm:$0xff] }
  0x6b   :  { %1310 = vmatpush1.bf16.msra.mxu1 %v1309_v0  ;;  %1184 = vmatprep.subr.bf16.mxu0 %v1183_v1  ;;  %v1331_v0 = vpack.c.bf16 %v286_v58, %v282_v57  ;;  %v281_v1 = vld [vmem:[%s2492_s2 + $0x7d0] sm:$0xff]  ;;  %v1205_v3 = vpack.c.bf16 %v283_v63, %v279_v62  ;;  %v698_v57 = vld [vmem:[%s2494_s4 + $0xc8] sm:$0xff]  ;;  %v729_v58 = vld [vmem:[%s2494_s4 + $0x1c0] sm:$0xff] }
  0x6c   :  { %1312 = vmatprep.subr.bf16.mxu1 %v1311_v5  ;;  %v1333_v4 = vpack.c.bf16 %v285_v2, %v281_v1  ;;  %v25_v5 = vld [vmem:[%s2493_s1 + $0x10] sm:$0xff]  ;;  %v682_v62 = vld [vmem:[%s2494_s4 + $0x48] sm:$0xff]  ;;  %v713_v1 = vld [vmem:[%s2494_s4 + $0x140] sm:$0xff] }
  0x6d   :  { %v714_v2 = vld [vmem:[%s2494_s4 + $0x148] sm:$0xff] }
  0x6e   :  { %1186 = vmatpush1.bf16.msra.mxu0 %v1185_v11  ;;  %v1335_v11 = vpack.c.bf16 %v690_v9, %v689_v8  ;;  %v732_v8 = vld [vmem:[%s2494_s4 + $0x1d8] sm:$0xff]  ;;  %v683_v9 = vld [vmem:[%s2494_s4 + $0x50] sm:$0xff] }
  0x6f   :  { %1314 = vmatpush1.bf16.msra.mxu1 %v1313_v12  ;;  %1188 = vmatprep.subr.bf16.mxu0 %v1187_v13  ;;  %v722_v12 = vld [vmem:[%s2494_s4 + $0x188] sm:$0xff]  ;;  %v673_v13 = vld [vmem:[%s2494_s4] sm:$0xff] }
  0x70   :  { %1316 = vmatprep.subr.bf16.mxu1 %v1315_v17  ;;  %v1367_v15 = vpack.c.bf16 %v722_v12, %v721_v10  ;;  %v1337_v16 = vpack.c.bf16 %v674_v14, %v673_v13  ;;  %v705_v17 = vld [vmem:[%s2494_s4 + $0x100] sm:$0xff]  ;;  %v684_v10 = vld [vmem:[%s2494_s4 + $0x58] sm:$0xff]  ;;  %v715_v13 = vld [vmem:[%s2494_s4 + $0x150] sm:$0xff] }
  0x71   :  { %v1369_v19 = vpack.c.bf16 %v706_v18, %v705_v17  ;;  %v1357_v12 = vpack.c.bf16 %v684_v10, %v683_v9  ;;  %v716_v14 = vld [vmem:[%s2494_s4 + $0x158] sm:$0xff]  ;;  %v702_v17 = vld [vmem:[%s2494_s4 + $0xe8] sm:$0xff]  ;;  %v733_v18 = vld [vmem:[%s2494_s4 + $0x1e0] sm:$0xff] }
  0x72   :  { %1190 = vmatpush1.bf16.msra.mxu0 %v1189_v23  ;;  %v1339_v23 = vpack.c.bf16 %v692_v21, %v691_v20  ;;  %v734_v20 = vld [vmem:[%s2494_s4 + $0x1e8] sm:$0xff]  ;;  %v685_v21 = vld [vmem:[%s2494_s4 + $0x60] sm:$0xff] }
  0x73   :  { %1318 = vmatpush1.bf16.msra.mxu1 %v1317_v24  ;;  %1192 = vmatprep.subr.bf16.mxu0 %v1191_v25  ;;  %v724_v24 = vld [vmem:[%s2494_s4 + $0x198] sm:$0xff]  ;;  %v675_v25 = vld [vmem:[%s2494_s4 + $0x10] sm:$0xff] }
  0x74   :  { %1320 = vmatprep.subr.bf16.mxu1 %v1319_v29  ;;  %v1371_v27 = vpack.c.bf16 %v724_v24, %v723_v22  ;;  %v1341_v28 = vpack.c.bf16 %v676_v26, %v675_v25  ;;  %v707_v29 = vld [vmem:[%s2494_s4 + $0x110] sm:$0xff]  ;;  %v686_v22 = vld [vmem:[%s2494_s4 + $0x68] sm:$0xff]  ;;  %v717_v25 = vld [vmem:[%s2494_s4 + $0x160] sm:$0xff] }
  0x75   :  { %v1373_v31 = vpack.c.bf16 %v708_v30, %v707_v29  ;;  %v1361_v24 = vpack.c.bf16 %v686_v22, %v685_v21  ;;  %v718_v26 = vld [vmem:[%s2494_s4 + $0x168] sm:$0xff]  ;;  %v704_v29 = vld [vmem:[%s2494_s4 + $0xf8] sm:$0xff]  ;;  %v735_v30 = vld [vmem:[%s2494_s4 + $0x1f0] sm:$0xff] }
  0x76   :  { %1194 = vmatpush1.bf16.msra.mxu0 %v1193_v35  ;;  %v1343_v35 = vpack.c.bf16 %v694_v33, %v693_v32  ;;  %v736_v32 = vld [vmem:[%s2494_s4 + $0x1f8] sm:$0xff]  ;;  %v687_v33 = vld [vmem:[%s2494_s4 + $0x70] sm:$0xff] }
  0x77   :  { %1322 = vmatpush1.bf16.msra.mxu1 %v1321_v36  ;;  %1196 = vmatprep.subr.bf16.mxu0 %v1195_v37  ;;  %v726_v36 = vld [vmem:[%s2494_s4 + $0x1a8] sm:$0xff]  ;;  %v677_v37 = vld [vmem:[%s2494_s4 + $0x20] sm:$0xff] }
  0x78   :  { %1324 = vmatprep.subr.bf16.mxu1 %v1323_v41  ;;  %v1375_v39 = vpack.c.bf16 %v726_v36, %v725_v34  ;;  %v1345_v40 = vpack.c.bf16 %v678_v38, %v677_v37  ;;  %v709_v41 = vld [vmem:[%s2494_s4 + $0x120] sm:$0xff]  ;;  %v688_v34 = vld [vmem:[%s2494_s4 + $0x78] sm:$0xff]  ;;  %v719_v37 = vld [vmem:[%s2494_s4 + $0x170] sm:$0xff] }
  0x79   :  { %v1377_v43 = vpack.c.bf16 %v710_v42, %v709_v41  ;;  %v1365_v36 = vpack.c.bf16 %v688_v34, %v687_v33  ;;  %v720_v38 = vld [vmem:[%s2494_s4 + $0x178] sm:$0xff]  ;;  %v894_v41 = vld [vmem:[%s2495_s0] sm:$0xff]  ;;  %v289_v42 = vlaneseq }
  0x7a   :  { %1198 = vmatpush1.bf16.msra.mxu0 %v1197_v47  ;;  %v1347_v47 = vpack.c.bf16 %v696_v45, %v695_v44  ;;  %v287_v45 = vld [vmem:[%s2496_s3] sm:$0xf] }
  0x7b   :  { %1326 = vmatpush1.bf16.msra.mxu1 %v1325_v48  ;;  %1200 = vmatprep.subr.bf16.mxu0 %v1199_v49  ;;  %v728_v48 = vld [vmem:[%s2494_s4 + $0x1b8] sm:$0xff]  ;;  %v679_v49 = vld [vmem:[%s2494_s4 + $0x30] sm:$0xff] }
  0x7c   :  { %1328 = vmatprep.subr.bf16.mxu1 %v1327_v53  ;;  %v1379_v51 = vpack.c.bf16 %v728_v48, %v727_v46  ;;  %v1349_v52 = vpack.c.bf16 %v680_v50, %v679_v49  ;;  %v711_v53 = vld [vmem:[%s2494_s4 + $0x130] sm:$0xff] }
  0x7d   :  { %v1381_v55 = vpack.c.bf16 %v712_v54, %v711_v53 }
  0x7e   :  { %1202 = vmatpush1.bf16.msra.mxu0 %v1201_v59  ;;  %v1351_v59 = vpack.c.bf16 %v698_v57, %v697_v56 }
  0x7f   :  { %1330 = vmatpush1.bf16.msra.mxu1 %v1329_v60  ;;  %1204 = vmatprep.subr.bf16.mxu0 %v1203_v61  ;;  %v730_v60 = vld [vmem:[%s2494_s4 + $0x1c8] sm:$0xff]  ;;  %v681_v61 = vld [vmem:[%s2494_s4 + $0x40] sm:$0xff] }
  0x80   :  { %1332 = vmatprep.subr.bf16.mxu1 %v1331_v0  ;;  %v1383_v63 = vpack.c.bf16 %v730_v60, %v729_v58  ;;  %v1353_v0 = vpack.c.bf16 %v682_v62, %v681_v61 }
  0x82   :  { %1206 = vmatpush1.bf16.msra.mxu0 %v1205_v3  ;;  %v1385_v3 = vpack.c.bf16 %v714_v2, %v713_v1 }
  0x83   :  { %1334 = vmatpush1.bf16.msra.mxu1 %v1333_v4  ;;  %1336 = vmatprep.subr.bf16.mxu0 %v1335_v11  ;;  %v699_v4 = vld [vmem:[%s2494_s4 + $0xd0] sm:$0xff] }
  0x84   :  { %1368 = vmatprep.subr.bf16.mxu1 %v1367_v15  ;;  %v1389_v15 = vpack.c.bf16 %v716_v14, %v715_v13 }
  0x85   :  { %451 = vmatmul.mubr.f32.vlgmr.msra.gmra.mrb[0].mxu0 %v25_v5 }
  0x86   :  { %605 = vmatmul.mubr.f32.vlgmr.msra.gmra.mrb[0].mxu1 %v25_v5  ;;  %456 = vmatprep.mubr.f32.mxu0 %v30_v6  ;;  %v700_v5 = vld [vmem:[%s2494_s4 + $0xd8] sm:$0xff] }
  0x87   :  { %610 = vmatprep.mubr.f32.mxu1 %v30_v6  ;;  %1338 = vmatpush3.bf16.msra.mxu0 %v1337_v16  ;;  %v731_v6 = vld [vmem:[%s2494_s4 + $0x1d0] sm:$0xff]  ;;  %v701_v16 = vld [vmem:[%s2494_s4 + $0xe0] sm:$0xff] }
  0x88   :  { %1370 = vmatpush3.bf16.msra.mxu1 %v1369_v19  ;;  %1340 = vmatprep.subr.bf16.mxu0 %v1339_v23  ;;  %v1387_v11 = vpack.c.bf16 %v732_v8, %v731_v6  ;;  %v1359_v19 = vpack.c.bf16 %v702_v17, %v701_v16  ;;  %v1391_v23 = vpack.c.bf16 %v734_v20, %v733_v18 }
  0x89   :  { %457 = vmatmul.mubr.f32.gmra.mrb[2].mxu0 %v29_v7  ;;  %1372 = vmatprep.subr.bf16.mxu1 %v1371_v27  ;;  %v1393_v27 = vpack.c.bf16 %v718_v26, %v717_v25 }
  0x8a   :  { %611 = vmatmul.mubr.f32.gmra.mrb[2].mxu1 %v29_v7  ;;  %v1355_v7 = vpack.c.bf16 %v700_v5, %v699_v4 }
  0x8b   :  { %1342 = vmatpush3.bf16.msra.mxu0 %v1341_v28  ;;  %v703_v28 = vld [vmem:[%s2494_s4 + $0xf0] sm:$0xff] }
  0x8c   :  { %1374 = vmatpush3.bf16.msra.mxu1 %v1373_v31  ;;  %1344 = vmatprep.subr.bf16.mxu0 %v1343_v35  ;;  %v1363_v31 = vpack.c.bf16 %v704_v29, %v703_v28  ;;  %v1395_v35 = vpack.c.bf16 %v736_v32, %v735_v30 }
  0x8d   :  { %1376 = vmatprep.subr.bf16.mxu1 %v1375_v39  ;;  %v1397_v39 = vpack.c.bf16 %v720_v38, %v719_v37 }
  0x8f   :  { %1346 = vmatpush3.bf16.msra.mxu0 %v1345_v40  ;;  %v1455_v40 = vmov 0  }
  0x90   :  { %1378 = vmatpush3.bf16.msra.mxu1 %v1377_v43  ;;  %1348 = vmatprep.subr.bf16.mxu0 %v1347_v47  ;;  %v290_v43 = vshrl.u32 %v289_v42, 7 }
  0x91   :  { %1380 = vmatprep.subr.bf16.mxu1 %v1379_v51  ;;  %1422 = vset.pattern.permute.xlu0 %v1455_v40 }
  0x92   :  { %898 = vperm.xlu0 %1422, %v894_v41   ;;  %v291_v44 = vsub.s32 0, %v290_v43  ;;  %v299_v46 = vsub.s32 2, %v290_v43  ;;  %v295_v47 = vsub.s32 1, %v290_v43  ;;  %v303_v48 = vsub.s32 3, %v290_v43 }
  0x93   :  { %1350 = vmatpush3.bf16.msra.mxu0 %v1349_v52 }
  0x94   :  { %1382 = vmatpush3.bf16.msra.mxu1 %v1381_v55  ;;  %1352 = vmatprep.subr.bf16.mxu0 %v1351_v59  ;;  %v292_v49 = vrot.slane %v287_v45, %v291_v44  ;;  %v300_v50 = vrot.slane %v287_v45, %v299_v46  ;;  %v296_v51 = vrot.slane %v287_v45, %v295_v47  ;;  %v1456_v46 = vmov 0.0|0.0  }
  0x95   :  { %1384 = vmatprep.subr.bf16.mxu1 %v1383_v63  ;;  %v304_v52 = vrot.slane %v287_v45, %v303_v48  ;;  %v1458_v47 = vmov 0.0  }
  0x97   :  { %1354 = vmatpush3.bf16.msra.mxu0 %v1353_v0 }
  0x98   :  { %1386 = vmatpush3.bf16.msra.mxu1 %v1385_v3  ;;  %1356 = vmatprep.subr.bf16.mxu0 %v1355_v7 }
  0x99   :  { %1388 = vmatprep.subr.bf16.mxu1 %v1387_v11 }
  0x9b   :  { %1358 = vmatpush3.bf16.msra.mxu0 %v1357_v12 }
  0x9c   :  { %1390 = vmatpush3.bf16.msra.mxu1 %v1389_v15  ;;  %1360 = vmatprep.subr.bf16.mxu0 %v1359_v19 }
  0x9d   :  { %1392 = vmatprep.subr.bf16.mxu1 %v1391_v23 }
  0x9f   :  { %1362 = vmatpush3.bf16.msra.mxu0 %v1361_v24 }
  0xa0   :  { %1394 = vmatpush3.bf16.msra.mxu1 %v1393_v27  ;;  %1364 = vmatprep.subr.bf16.mxu0 %v1363_v31 }
  0xa1   :  { %1396 = vmatprep.subr.bf16.mxu1 %v1395_v35 }
  0xa3   :  { %1366 = vmatpush3.bf16.msra.mxu0 %v1365_v36 }
  0xa4   :  { %1398 = vmatpush3.bf16.msra.mxu1 %v1397_v39  ;;  %1399 = vmatprep.subr.bf16.mxu0 %v1456_v46 }
 0x158   :  { %v452_v53 = vpop.f32.mrb[0].mxu0 }
 0x159   :  { %v1402_v54 = vadd.f32 %v452_v53, %v292_v49  ;;  %v606_v55 = vpop.f32.mrb[0].mxu1  ;;  %v454_v56 = vpop.f32.mrb[1].mxu0 }
 0x15a   :  { %v1406_v57 = vadd.f32 %v606_v55, %v300_v50  ;;  %v1403_v58 = vadd.f32 %v454_v56, %v296_v51  ;;  %v608_v59 = vpop.f32.mrb[1].mxu1 }
 0x15b   :  { %v982_v60 = vmul.f32 -1.442695, %v1402_v54  ;;  %v1407_v61 = vadd.f32 %v608_v59, %v304_v52 }
 0x15c   :  { %v984_v62 = vmul.f32 -1.442695, %v1406_v57  ;;  %v983_v63 = vmul.f32 -1.442695, %v1403_v58  ;;  %v458_v0 = vpop.f32.mrb[2].mxu0 }
 0x15d   :  { %1423 = vpow2.f32 %v982_v60  ;;  %v985_v1 = vmul.f32 -1.442695, %v1407_v61  ;;  %v1404_v2 = vadd.f32 %v458_v0, %v292_v49  ;;  %v612_v3 = vpop.f32.mrb[2].mxu1  ;;  %v460_v4 = vpop.f32.mrb[3].mxu0 }
 0x15e   :  { %1425 = vpow2.f32 %v984_v62  ;;  %v1408_v5 = vadd.f32 %v612_v3, %v300_v50  ;;  %v1405_v6 = vadd.f32 %v460_v4, %v296_v51  ;;  %v614_v7 = vpop.f32.mrb[3].mxu1  ;;  %v990_v50 = vld [vmem:[%s2497_s5] ss:$0 sm:$0xff] }
 0x15f   :  { %1427 = vpow2.f32 %v983_v63  ;;  %v986_v8 = vmul.f32 -1.442695, %v1404_v2  ;;  %v1409_v9 = vadd.f32 %v614_v7, %v304_v52  ;;  %v896_v63 = vand.u32 127, %v289_v42 }
 0x160   :  { %1429 = vpow2.f32 %v985_v1  ;;  %v988_v10 = vmul.f32 -1.442695, %v1408_v5  ;;  %v987_v11 = vmul.f32 -1.442695, %v1405_v6  ;;  %v899_v1 = vpop.permute.xlu0 %898 }
 0x161   :  { %1431 = vpow2.f32 %v986_v8  ;;  %v989_v12 = vmul.f32 -1.442695, %v1409_v9  ;;  %vm900_vm1 = vcmp.eq.s32.totalorder %v896_v63, %v899_v1 }
 0x162   :  { %1433 = vpow2.f32 %v988_v10  ;;  %v991_v4 = vsel %vm900_vm1, 1.0, %v1458_v47 }
 0x163   :  { %1435 = vpow2.f32 %v987_v11 }
 0x164   :  { %1437 = vpow2.f32 %v989_v12 }
 0x167   :  { %v1424_v13 = vpop.eup %1423 }
 0x168   :  { %v1426_v14 = vpop.eup %1425  ;;  %v641_v15 = vadd.f32 1.0, %v1424_v13 }
 0x169   :  { %v1428_v16 = vpop.eup %1427  ;;  %v643_v17 = vadd.f32 1.0, %v1426_v14 }
 0x16a   :  { %v1430_v18 = vpop.eup %1429  ;;  %1439 = vrcp.f32 %v641_v15  ;;  %v642_v19 = vadd.f32 1.0, %v1428_v16 }
 0x16b   :  { %v1432_v20 = vpop.eup %1431  ;;  %1441 = vrcp.f32 %v643_v17  ;;  %v644_v21 = vadd.f32 1.0, %v1430_v18 }
 0x16c   :  { %v1434_v22 = vpop.eup %1433  ;;  %1443 = vrcp.f32 %v642_v19  ;;  %v645_v23 = vadd.f32 1.0, %v1432_v20 }
 0x16d   :  { %v1436_v24 = vpop.eup %1435  ;;  %1445 = vrcp.f32 %v644_v21  ;;  %v647_v25 = vadd.f32 1.0, %v1434_v22 }
 0x16e   :  { %v1438_v26 = vpop.eup %1437  ;;  %1447 = vrcp.f32 %v645_v23  ;;  %v646_v27 = vadd.f32 1.0, %v1436_v24 }
 0x16f   :  { %1449 = vrcp.f32 %v647_v25  ;;  %v648_v28 = vadd.f32 1.0, %v1438_v26 }
 0x170   :  { %1451 = vrcp.f32 %v646_v27 }
 0x171   :  { %1453 = vrcp.f32 %v648_v28 }
 0x174   :  { %v1440_v29 = vpop.eup %1439 }
 0x175   :  { %v1442_v30 = vpop.eup %1441  ;;  %v665_v35 = vmul.f32 %v1440_v29, %v1402_v54 }
 0x176   :  { %v1444_v31 = vpop.eup %1443  ;;  %v667_v38 = vmul.f32 %v1442_v30, %v1406_v57 }
 0x177   :  { %v1446_v32 = vpop.eup %1445  ;;  %v666_v33 = vmul.f32 %v1444_v31, %v1403_v58 }
 0x178   :  { %v1448_v34 = vpop.eup %1447  ;;  %v668_v36 = vmul.f32 %v1446_v32, %v1407_v61 }
 0x179   :  { %v1450_v37 = vpop.eup %1449  ;;  %808 = vmatprep.mubr.f32.mxu0 %v666_v33  ;;  %v669_v43 = vmul.f32 %v1448_v34, %v1404_v2 }
 0x17a   :  { %v1452_v39 = vpop.eup %1451  ;;  %883 = vmatprep.mubr.f32.mxu1 %v668_v36  ;;  %809 = vmatmul.mubr.f32.vlgmr.msra.gmra.mrb[4].mxu0 %v665_v35  ;;  %v671_v45 = vmul.f32 %v1450_v37, %v1408_v5 }
 0x17b   :  { %v1454_v40 = vpop.eup %1453  ;;  %v670_v41 = vmul.f32 %v1452_v39, %v1405_v6  ;;  %884 = vmatmul.mubr.f32.vlgmr.msra.gmra.mrb[4].mxu1 %v667_v38 }
 0x17c   :  { %v672_v44 = vmul.f32 %v1454_v40, %v1409_v9 }
 0x17d   :  { %813 = vmatprep.mubr.f32.mxu0 %v670_v41 }
 0x17e   :  { %888 = vmatprep.mubr.f32.mxu1 %v672_v44  ;;  %814 = vmatmul.mubr.f32.gmra.mrb[6].mxu0 %v669_v43 }
 0x17f   :  { %889 = vmatmul.mubr.f32.gmra.mrb[6].mxu1 %v671_v45  ;;  %1076 = vmatprep.mubr.msk.f32.mxu0 %vm1457_vm0, %v1458_v47 }
 0x24d   :  { %v1025_v48 = vpop.f32.mrb[4].mxu0 }
 0x24e   :  { %v1063_v49 = vpop.f32.mrb[4].mxu1  ;;  %v1026_v51 = vpop.f32.mrb[5].mxu0 }
 0x24f   :  { %v1027_v52 = vadd.f32 %v1026_v51, %v1025_v48  ;;  %v1064_v53 = vpop.f32.mrb[5].mxu1 }
 0x250   :  { %v1065_v54 = vadd.f32 %v1064_v53, %v1063_v49 }
 0x251   :  { %v811_v55 = vadd.f32 %v1027_v52, %v990_v50  ;;  %v1028_v56 = vpop.f32.mrb[6].mxu0 }
 0x252   :  { %v1066_v57 = vpop.f32.mrb[6].mxu1  ;;  %v1029_v58 = vpop.f32.mrb[7].mxu0 }
 0x253   :  { %v886_v59 = vadd.f32 %v1065_v54, %v811_v55  ;;  %v1030_v60 = vadd.f32 %v1029_v58, %v1028_v56  ;;  %v1067_v61 = vpop.f32.mrb[7].mxu1 }
 0x254   :  { %v1068_v62 = vadd.f32 %v1067_v61, %v1066_v57 }
 0x255   :  { %v816_v0 = vadd.f32 %v1030_v60, %v990_v50 }
 0x257   :  { %v891_v2 = vadd.f32 %v1068_v62, %v816_v0 }
 0x259   :  { %v1400_v3 = vpack.c.bf16 %v891_v2, %v886_v59 }
 0x25b   :  { %1401 = vmatpush3.bf16.msra.mxu0 %v1400_v3 }
 0x25e   :  { %1077 = vmatmul.mubr.msk.f32.vlgmr.msra.gmra.mrb[8].mxu0 %vm903_vm2, %v991_v4 }
 0x331   :  { %v973_v5 = vpop.f32.mrb[8].mxu0 }
 0x332   :  { %977 = vst [vmem:[%s2498_s6] sm:$0xff] %v973_v5  ;;  %v1078_v6 = vpop.f32.mrb[9].mxu0 }

</bundles_post_ra>
